<compile_context>
chip_gen: v6e
topology: v6e:2x2x1
jax: 0.10.0
libtpu: 0.0.40
codegen_flags: <defaults>
</compile_context>

<pallas_src>
import jax
import jax.numpy as jnp
from jax.experimental import pallas as pl
from jax.experimental.pallas import tpu as pltpu

# --- hyper-parameters (the globals the PyTorch file relies on) -------------
OUT_DIM = 8                        # "out_dim"
R_I_COLS = 4                       # R_I.shape[1]
IN_DIM = OUT_DIM * R_I_COLS        # 32  -> linear1 input
DENSE_HIDDEN1 = 64
DENSE_HIDDEN2 = 32
DENSE_OUT = 16
DROP_P = 0.5
N_ITEMS = 16                       # batch of item embeddings (example)

MASK_W = DENSE_HIDDEN1 + DENSE_HIDDEN2   # packed dropout-mask width (96)


def _round_up(x, m):
    return (x + m - 1) // m * m


def item_linear_kernel(x_ref, m_ref,                     # per-row tiles
                       w1_ref, b1_ref, w2_ref, b2_ref,   # resident weights
                       w3_ref, b3_ref,
                       o_ref):                           # per-row output tile
    x = x_ref[...]
    mask = m_ref[...]                                    # 0/1 float mask, [tile, 96]

    # Linear1 + ReLU + Dropout (scale already folded into w2)
    h = jnp.dot(x, w1_ref[...], preferred_element_type=jnp.float32)
    h = jnp.maximum(h + b1_ref[...], 0.0)
    h = h * mask[:, :DENSE_HIDDEN1]

    # Linear2 + ReLU + Dropout (scale already folded into w3)
    h = jnp.dot(h, w2_ref[...], preferred_element_type=jnp.float32)
    h = jnp.maximum(h + b2_ref[...], 0.0)
    h = h * mask[:, DENSE_HIDDEN1:DENSE_HIDDEN1 + DENSE_HIDDEN2]

    # Output linear
    out = jnp.dot(h, w3_ref[...], preferred_element_type=jnp.float32) + b3_ref[...]
    o_ref[...] = out.astype(o_ref.dtype)


def item_linear(item_embed, params, dropout_key, *, tile_n=512):
    """item_embed: [N, IN_DIM] float32; params: (w1,b1,w2,b2,w3,b3).

    dropout_key: caller must supply a fresh key per forward pass (matches
    PyTorch's F.dropout drawing a fresh mask each call in training mode).
    """
    w1, b1, w2, b2, w3, b3 = params

    # Fold the inverted-dropout scale 1/(1-p) into the downstream weights.
    scale = 1.0 / (1.0 - DROP_P)
    w2s = w2 * scale
    w3s = w3 * scale

    n = item_embed.shape[0]
    tile = min(tile_n, _round_up(n, 8))          # large row tiles, multiple of 8
    n_pad = _round_up(n, tile)
    if n_pad != n:
        item_embed = jnp.pad(item_embed, ((0, n_pad - n), (0, 0)))

    # Fresh Bernoulli keep-masks for both dropout layers, packed into one array.
    mask = jax.random.bernoulli(
        dropout_key, 1.0 - DROP_P, (n_pad, MASK_W)).astype(item_embed.dtype)

    grid = (n_pad // tile,)

    def row_spec(width):
        return pl.BlockSpec((tile, width), lambda i: (i, 0))

    def const_spec(shape):
        return pl.BlockSpec(shape, lambda i: (0, 0))

    flops = 2 * n_pad * (IN_DIM * DENSE_HIDDEN1
                         + DENSE_HIDDEN1 * DENSE_HIDDEN2
                         + DENSE_HIDDEN2 * DENSE_OUT)
    bytes_accessed = 4 * (n_pad * (IN_DIM + MASK_W + DENSE_OUT)
                          + w1.size + b1.size + w2.size + b2.size
                          + w3.size + b3.size)

    out = pl.pallas_call(
        item_linear_kernel,
        out_shape=jax.ShapeDtypeStruct((n_pad, DENSE_OUT), item_embed.dtype),
        grid=grid,
        in_specs=[
            row_spec(IN_DIM),                     # x tile
            row_spec(MASK_W),                     # packed dropout masks tile
            const_spec((IN_DIM, DENSE_HIDDEN1)),  # w1 (resident)
            const_spec((1, DENSE_HIDDEN1)),       # b1
            const_spec((DENSE_HIDDEN1, DENSE_HIDDEN2)),  # w2 * 2
            const_spec((1, DENSE_HIDDEN2)),       # b2
            const_spec((DENSE_HIDDEN2, DENSE_OUT)),      # w3 * 2
            const_spec((1, DENSE_OUT)),           # b3
        ],
        out_specs=row_spec(DENSE_OUT),
        compiler_params=pltpu.CompilerParams(
            dimension_semantics=("parallel",)),
        cost_estimate=pl.CostEstimate(
            flops=flops, transcendentals=0, bytes_accessed=bytes_accessed),
    )(item_embed, mask, w1, b1, w2s, b2, w3s, b3)

    return out[:n]


def init_params(key):
    """Deterministic init matching nn.Linear's default U(-1/sqrt(fan_in), ..)."""
    def linear(k, fan_in, fan_out):
        kw, kb = jax.random.split(k)
        bound = 1.0 / jnp.sqrt(float(fan_in))
        w = jax.random.uniform(kw, (fan_in, fan_out), jnp.float32, -bound, bound)
        b = jax.random.uniform(kb, (1, fan_out), jnp.float32, -bound, bound)
        return w, b

    k1, k2, k3 = jax.random.split(key, 3)
    w1, b1 = linear(k1, IN_DIM, DENSE_HIDDEN1)
    w2, b2 = linear(k2, DENSE_HIDDEN1, DENSE_HIDDEN2)
    w3, b3 = linear(k3, DENSE_HIDDEN2, DENSE_OUT)
    return (w1, b1, w2, b2, w3, b3)


if __name__ == "__main__":
    root = jax.random.PRNGKey(0)
    k_params, k_x, k_drop = jax.random.split(root, 3)

    params = init_params(k_params)
    x = jax.random.normal(k_x, (N_ITEMS, IN_DIM), jnp.float32)

    out = item_linear(x, params, k_drop)
    out = jax.block_until_ready(out)

    assert out.shape == (N_ITEMS, DENSE_OUT)
    assert bool(jnp.all(jnp.isfinite(out)))
    print("KERNEL_OK")
</pallas_src>

<mosaic_0001>
module attributes {stable_mosaic.version = 11 : i64} {
  func.func @item_linear_kernel(%arg0: i32, %arg1: memref<16x32xf32, #tpu.memory_space<vmem>>, %arg2: memref<16x96xf32, #tpu.memory_space<vmem>>, %arg3: memref<32x64xf32, #tpu.memory_space<vmem>>, %arg4: memref<1x64xf32, #tpu.memory_space<vmem>>, %arg5: memref<64x32xf32, #tpu.memory_space<vmem>>, %arg6: memref<1x32xf32, #tpu.memory_space<vmem>>, %arg7: memref<32x16xf32, #tpu.memory_space<vmem>>, %arg8: memref<1x16xf32, #tpu.memory_space<vmem>>, %arg9: memref<16x16xf32, #tpu.memory_space<vmem>>) attributes {dimension_semantics = [#tpu.dimension_semantics<parallel>], iteration_bounds = array<i64: 1>, scalar_prefetch = 0 : i64, scratch_operands = 0 : i64, tpu.core_type = #tpu.core_type<tc>, window_params = [{transform_indices = @transform_0, window_bounds = array<i64: 16, 32>}, {transform_indices = @transform_1, window_bounds = array<i64: 16, 96>}, {pipeline_mode = #tpu.pipeline_mode<synchronous>, transform_indices = @transform_2, window_bounds = array<i64: 32, 64>}, {pipeline_mode = #tpu.pipeline_mode<synchronous>, transform_indices = @transform_3, window_bounds = array<i64: 1, 64>}, {pipeline_mode = #tpu.pipeline_mode<synchronous>, transform_indices = @transform_4, window_bounds = array<i64: 64, 32>}, {pipeline_mode = #tpu.pipeline_mode<synchronous>, transform_indices = @transform_5, window_bounds = array<i64: 1, 32>}, {pipeline_mode = #tpu.pipeline_mode<synchronous>, transform_indices = @transform_6, window_bounds = array<i64: 32, 16>}, {pipeline_mode = #tpu.pipeline_mode<synchronous>, transform_indices = @transform_7, window_bounds = array<i64: 1, 16>}, {transform_indices = @transform_8, window_bounds = array<i64: 16, 16>}]} {
    %c0 = arith.constant 0 : index
    %c0_0 = arith.constant 0 : index
    %0 = vector.load %arg1[%c0, %c0_0] : memref<16x32xf32, #tpu.memory_space<vmem>>, vector<16x32xf32>
    %c0_1 = arith.constant 0 : index
    %c0_2 = arith.constant 0 : index
    %1 = vector.load %arg2[%c0_1, %c0_2] : memref<16x96xf32, #tpu.memory_space<vmem>>, vector<16x96xf32>
    %c0_3 = arith.constant 0 : index
    %c0_4 = arith.constant 0 : index
    %2 = vector.load %arg3[%c0_3, %c0_4] : memref<32x64xf32, #tpu.memory_space<vmem>>, vector<32x64xf32>
    %cst = arith.constant dense<0.000000e+00> : vector<16x64xf32>
    %3 = tpu.matmul %0, %2, %cst {dimension_numbers = #tpu.dot_dimension_numbers<[1], [0], [0], [1], [0, 0, 1, 1], [], []>} : vector<16x32xf32>, vector<32x64xf32>, vector<16x64xf32> -> vector<16x64xf32>
    %c0_5 = arith.constant 0 : index
    %c0_6 = arith.constant 0 : index
    %4 = vector.load %arg4[%c0_5, %c0_6] : memref<1x64xf32, #tpu.memory_space<vmem>>, vector<1x64xf32>
    %5 = vector.broadcast %4 : vector<1x64xf32> to vector<16x64xf32>
    %6 = arith.addf %3, %5 : vector<16x64xf32>
    %cst_7 = arith.constant 0.000000e+00 : f32
    %7 = vector.broadcast %cst_7 : f32 to vector<16x64xf32>
    %8 = arith.maximumf %6, %7 : vector<16x64xf32>
    %9 = vector.extract_strided_slice %1 {offsets = [0, 0], sizes = [16, 64], strides = [1, 1]} : vector<16x96xf32> to vector<16x64xf32>
    %10 = arith.mulf %8, %9 : vector<16x64xf32>
    %c0_8 = arith.constant 0 : index
    %c0_9 = arith.constant 0 : index
    %11 = vector.load %arg5[%c0_8, %c0_9] : memref<64x32xf32, #tpu.memory_space<vmem>>, vector<64x32xf32>
    %cst_10 = arith.constant dense<0.000000e+00> : vector<16x32xf32>
    %12 = tpu.matmul %10, %11, %cst_10 {dimension_numbers = #tpu.dot_dimension_numbers<[1], [0], [0], [1], [0, 0, 1, 1], [], []>} : vector<16x64xf32>, vector<64x32xf32>, vector<16x32xf32> -> vector<16x32xf32>
    %c0_11 = arith.constant 0 : index
    %c0_12 = arith.constant 0 : index
    %13 = vector.load %arg6[%c0_11, %c0_12] : memref<1x32xf32, #tpu.memory_space<vmem>>, vector<1x32xf32>
    %14 = vector.broadcast %13 : vector<1x32xf32> to vector<16x32xf32>
    %15 = arith.addf %12, %14 : vector<16x32xf32>
    %cst_13 = arith.constant 0.000000e+00 : f32
    %16 = vector.broadcast %cst_13 : f32 to vector<16x32xf32>
    %17 = arith.maximumf %15, %16 : vector<16x32xf32>
    %18 = vector.extract_strided_slice %1 {offsets = [0, 64], sizes = [16, 32], strides = [1, 1]} : vector<16x96xf32> to vector<16x32xf32>
    %19 = arith.mulf %17, %18 : vector<16x32xf32>
    %c0_14 = arith.constant 0 : index
    %c0_15 = arith.constant 0 : index
    %20 = vector.load %arg7[%c0_14, %c0_15] : memref<32x16xf32, #tpu.memory_space<vmem>>, vector<32x16xf32>
    %cst_16 = arith.constant dense<0.000000e+00> : vector<16x16xf32>
    %21 = tpu.matmul %19, %20, %cst_16 {dimension_numbers = #tpu.dot_dimension_numbers<[1], [0], [0], [1], [0, 0, 1, 1], [], []>} : vector<16x32xf32>, vector<32x16xf32>, vector<16x16xf32> -> vector<16x16xf32>
    %c0_17 = arith.constant 0 : index
    %c0_18 = arith.constant 0 : index
    %22 = vector.load %arg8[%c0_17, %c0_18] : memref<1x16xf32, #tpu.memory_space<vmem>>, vector<1x16xf32>
    %23 = vector.broadcast %22 : vector<1x16xf32> to vector<16x16xf32>
    %24 = arith.addf %21, %23 : vector<16x16xf32>
    %c0_19 = arith.constant 0 : index
    %c0_20 = arith.constant 0 : index
    %25 = vector.load %arg9[%c0_19, %c0_20] : memref<16x16xf32, #tpu.memory_space<vmem>>, vector<16x16xf32>
    tpu.vector_store %arg9[%c0_19, %c0_20], %24 {strides = array<i32>} : memref<16x16xf32, #tpu.memory_space<vmem>>, vector<16x16xf32>,
    return
  }
  func.func @transform_0(%arg0: i32) -> (i32, i32) {
    %c0_i32 = arith.constant 0 : i32
    %c0_i32_0 = arith.constant 0 : i32
    return %arg0, %c0_i32 : i32, i32
  }
  func.func @transform_1(%arg0: i32) -> (i32, i32) {
    %c0_i32 = arith.constant 0 : i32
    %c0_i32_0 = arith.constant 0 : i32
    return %arg0, %c0_i32 : i32, i32
  }
  func.func @transform_2(%arg0: i32) -> (i32, i32) {
    %c0_i32 = arith.constant 0 : i32
    %c0_i32_0 = arith.constant 0 : i32
    %c0_i32_1 = arith.constant 0 : i32
    return %c0_i32, %c0_i32_0 : i32, i32
  }
  func.func @transform_3(%arg0: i32) -> (i32, i32) {
    %c0_i32 = arith.constant 0 : i32
    %c0_i32_0 = arith.constant 0 : i32
    %c0_i32_1 = arith.constant 0 : i32
    return %c0_i32, %c0_i32_0 : i32, i32
  }
  func.func @transform_4(%arg0: i32) -> (i32, i32) {
    %c0_i32 = arith.constant 0 : i32
    %c0_i32_0 = arith.constant 0 : i32
    %c0_i32_1 = arith.constant 0 : i32
    return %c0_i32, %c0_i32_0 : i32, i32
  }
  func.func @transform_5(%arg0: i32) -> (i32, i32) {
    %c0_i32 = arith.constant 0 : i32
    %c0_i32_0 = arith.constant 0 : i32
    %c0_i32_1 = arith.constant 0 : i32
    return %c0_i32, %c0_i32_0 : i32, i32
  }
  func.func @transform_6(%arg0: i32) -> (i32, i32) {
    %c0_i32 = arith.constant 0 : i32
    %c0_i32_0 = arith.constant 0 : i32
    %c0_i32_1 = arith.constant 0 : i32
    return %c0_i32, %c0_i32_0 : i32, i32
  }
  func.func @transform_7(%arg0: i32) -> (i32, i32) {
    %c0_i32 = arith.constant 0 : i32
    %c0_i32_0 = arith.constant 0 : i32
    %c0_i32_1 = arith.constant 0 : i32
    return %c0_i32, %c0_i32_0 : i32, i32
  }
  func.func @transform_8(%arg0: i32) -> (i32, i32) {
    %c0_i32 = arith.constant 0 : i32
    %c0_i32_0 = arith.constant 0 : i32
    return %arg0, %c0_i32 : i32, i32
  }
}

</mosaic_0001>

<bundles_post_ra>
// kernel: tpu_custom_call.1
= control target key start
LH: loop header
LB: loop body
LE: loop exit
PB: predicated region body
PF: predicated region fallthrough
CT: control target
= control target key end

     0   :  { %vm45_vm0 = vcmask 261120   ;;  %s574_s0 = inlined_call_operand.vmem [shape: f32[16,32], index: 0, kind: input, shape index: {}]   ;;  %s575_s1 = inlined_call_operand.vmem [shape: f32[16,96], index: 1, kind: input, shape index: {}]   ;;  %s576_s2 = inlined_call_operand.vmem [shape: f32[32,64], index: 2, kind: input, shape index: {}]   ;;  %s577_s3 = inlined_call_operand.vmem [shape: f32[1,64], index: 3, kind: input, shape index: {}]   ;;  %s578_s4 = inlined_call_operand.vmem [shape: f32[64,32], index: 4, kind: input, shape index: {}]   ;;  %s579_s5 = inlined_call_operand.vmem [shape: f32[1,32], index: 5, kind: input, shape index: {}]   ;;  %s580_s6 = inlined_call_operand.vmem [shape: f32[32,16], index: 6, kind: input, shape index: {}]   ;;  %s581_s7 = inlined_call_operand.vmem [shape: f32[1,16], index: 7, kind: input, shape index: {}]   ;;  %s582_s8 = inlined_call_operand.hbm [shape: f32[16,16], index: 8, kind: output, shape index: {}]  }
   0x1   :  { %v37_v0 = vld [vmem:[%s576_s2 + $0x18] sm:$0xff]  ;;  %v36_v1 = vld [vmem:[%s576_s2 + $0x10] sm:$0xff]  ;;  %v30_v2 = vld [vmem:[%s574_s0] sm:$0xff] }
   0x2   :  { %382 = vmatprep.subr.mxu0 %v37_v0  ;;  %v35_v3 = vld [vmem:[%s576_s2 + $0x8] sm:$0xff]  ;;  %390 = vmatprep.mubr.msk.f32.mxu0 %vm45_vm0, %v30_v2  ;;  %v138_v4 = vld [vmem:[%s578_s4 + $0x38] sm:$0xff]  ;;  %v137_v5 = vld [vmem:[%s578_s4 + $0x30] sm:$0xff] }
   0x3   :  { %383 = vmatpush3.msra.mxu0 %v37_v0  ;;  %393 = vmatprep.subr.mxu1 %v138_v4 }
   0x4   :  { %384 = vmatprep.subr.mxu0 %v36_v1 }
   0x5   :  { %13 = vsyncpa [#allocation3], 0  ;;  %385 = vmatpush3.msra.mxu0 %v36_v1  ;;  %v34_v6 = vld [vmem:[%s576_s2] sm:$0xff]  ;;  %394 = vmatpush3.msra.mxu1 %v138_v4  ;;  %v136_v7 = vld [vmem:[%s578_s4 + $0x28] sm:$0xff]  ;;  %s449_s11 = smov 64   ;;  %vm146_vm1 = vcmask 523264  }
   0x6   :  { %386 = vmatprep.subr.mxu0 %v35_v3  ;;  %395 = vmatprep.subr.mxu1 %v137_v5  ;;  %v31_v8 = vld [vmem:[%s574_s0 + $0x8] sm:$0xff]  ;;  %v135_v9 = vld [vmem:[%s578_s4 + $0x20] sm:$0xff]  ;;  %v134_v10 = vld [vmem:[%s578_s4 + $0x18] sm:$0xff]  ;;  %s450_s23 = smov [#allocation2]   ;;  %vm332_vm2 = vcmask 130048  }
   0x7   :  { %387 = vmatpush3.msra.mxu0 %v35_v3  ;;  %396 = vmatpush3.msra.mxu1 %v137_v5  ;;  %v133_v11 = vld [vmem:[%s578_s4 + $0x10] sm:$0xff]  ;;  %v132_v12 = vld [vmem:[%s578_s4 + $0x8] sm:$0xff]  ;;  %v131_v13 = vld [vmem:[%s578_s4] sm:$0xff] }
   0x8   :  { %388 = vmatprep.subr.mxu0 %v34_v6  ;;  %397 = vmatprep.subr.mxu1 %v136_v7  ;;  %v32_v14 = vld [vmem:[%s575_s1] sm:$0xff]  ;;  %v33_v15 = vld [vmem:[%s575_s1 + $0x8] sm:$0xff]  ;;  %v243_v25 = vld [vmem:[%s580_s6 + $0x18] sm:$0xff] }
   0x9   :  { %389 = vmatpush3.msra.mxu0 %v34_v6  ;;  %398 = vmatpush3.msra.mxu1 %v136_v7  ;;  %v351_v16 = vld [vmem:[%s577_s3] ss:$0 sm:$0xff]  ;;  %v242_v26 = vld [vmem:[%s580_s6 + $0x10] sm:$0xff]  ;;  %v241_v27 = vld [vmem:[%s580_s6 + $0x8] sm:$0xff] }
   0xa   :  { %391 = vmatmul.mubr.msk.f32.vlgmr.msra.gmra.mxu0 %vm45_vm0, %v31_v8  ;;  %399 = vmatprep.subr.mxu1 %v135_v9  ;;  %v240_v28 = vld [vmem:[%s580_s6] sm:$0xff] }
   0xb   :  { %400 = vmatpush3.msra.mxu1 %v135_v9  ;;  %232 = vrot.lane.b32.xlu0 %v32_v14, %s449_s11  ;;  %v354_v29 = vld [vmem:[%s579_s5] ss:$0 sm:$0xff]  ;;  %s340_s5 = sshll.u32 %s450_s23, 4  ;;  %s341_s5 = int_to_ptr.vmem [resolvable:$true] %s340_s5 }
   0xc   :  { %401 = vmatprep.subr.mxu1 %v134_v10  ;;  %412 = vmatprep.subr.mxu0 %v243_v25  ;;  %v357_v40 = vld [vmem:[%s581_s7] ss:$0 sm:$0xff]  ;;  %s427_s24 = scalar_lea.vmem %s341_s5, 256  ;;  %p432_p1 = scmp.lt.s32.totalorder %s341_s5, %s341_s5 }
   0xd   :  { %402 = vmatpush3.msra.mxu1 %v134_v10  ;;  %413 = vmatpush3.msra.mxu0 %v243_v25  ;;  %p428_p0 = scmp.ne.s32.totalorder %s341_s5, %s427_s24  ;;  %p433_p2 = scmp.lt.s32.totalorder %s427_s24, %s427_s24 }
   0xe   :  { %403 = vmatprep.subr.mxu1 %v133_v11  ;;  %414 = vmatprep.subr.mxu0 %v242_v26 }
   0xf   :  { %404 = vmatpush3.msra.mxu1 %v133_v11  ;;  %234 = vrot.lane.b32.xlu0 %v33_v15, %s449_s11  ;;  %p434_p3 = por %p433_p2, %p432_p1 }
  0x10   :  { %405 = vmatprep.subr.mxu1 %v132_v12  ;;  %415 = vmatpush3.msra.mxu0 %v242_v26 }
  0x11   :  { %406 = vmatpush3.msra.mxu1 %v132_v12  ;;  %416 = vmatprep.subr.mxu0 %v241_v27  ;;  %p435_p4 = pnand %p434_p3, %p428_p0 }
  0x12   :  { %407 = vmatprep.subr.mxu1 %v131_v13  ;;  %417 = vmatpush3.msra.mxu0 %v241_v27 }
  0x13   :  { %408 = vmatpush3.msra.mxu1 %v131_v13  ;;  %418 = vmatprep.subr.mxu0 %v240_v28 }
  0x14   :  { %419 = vmatpush3.msra.mxu0 %v240_v28 }
  0x7d   :  { %v233_v30 = vpop.permute.xlu0 %232 }
  0x81   :  { %v235_v37 = vpop.permute.xlu0 %234 }
  0xca   :  { %v392_v17 = vpop.f32.mrf.mxu0 }
  0xcb   :  { %v124_v18 = vadd.f32 %v392_v17, %v351_v16 }
  0xcc   :  { %v118_v19 = vpop.f32.mrf.mxu0 }
  0xcd   :  { %v119_v20 = vadd.f32 %v351_v16, %v118_v19  ;;  %v128_v21 = vmax.f32 %v124_v18, 0.0 }
  0xcf   :  { %v127_v22 = vmax.f32 %v119_v20, 0.0  ;;  %v130_v24 = vmul.f32 %v128_v21, %v33_v15 }
  0xd1   :  { %v129_v23 = vmul.f32 %v127_v22, %v32_v14 }
  0xd3   :  { %409 = vmatprep.mubr.msk.f32.mxu1 %vm146_vm1, %v129_v23 }
  0xd4   :  { %410 = vmatmul.mubr.msk.f32.vlgmr.msra.gmra.mxu1 %vm146_vm1, %v130_v24 }
 0x194   :  { %v411_v31 = vpop.f32.mrf.mxu1 }
 0x195   :  { %v225_v32 = vadd.f32 %v411_v31, %v354_v29 }
 0x196   :  { %v219_v33 = vpop.f32.mrf.mxu1 }
 0x197   :  { %v220_v34 = vadd.f32 %v354_v29, %v219_v33  ;;  %v229_v35 = vmax.f32 %v225_v32, 0.0 }
 0x199   :  { %v228_v36 = vmax.f32 %v220_v34, 0.0  ;;  %v239_v39 = vmul.f32 %v235_v37, %v229_v35 }
 0x19b   :  { %v238_v38 = vmul.f32 %v233_v30, %v228_v36 }
 0x19d   :  { %420 = vmatprep.mubr.msk.f32.mxu0 %vm45_vm0, %v238_v38 }
 0x19e   :  { %421 = vmatmul.mubr.msk.f32.vlgmr.msra.gmra.mxu0 %vm45_vm0, %v239_v39 }
 0x25e   :  { %v422_v41 = vpop.f32.mrf.mxu0 }
 0x25f   :  { %v329_v42 = vadd.f32 %v422_v41, %v357_v40 }
 0x260   :  { %v323_v43 = vpop.f32.mrf.mxu0 }
 0x261   :  { %334 = vst.msk [vmem:[#allocation2 + $0x8] sm:$0xff] %vm332_vm2, %v329_v42  ;;  %v324_v44 = vadd.f32 %v357_v40, %v323_v43 }
 0x263   :  { %333 = vst.msk [vmem:[#allocation2] sm:$0xff] %vm332_vm2, %v324_v44 }
 0x264   :  { %438 = shalt.err (!%p435_p4)
}
 0x265   :  { %s451_s25 = smov 128   ;;  %s452_s0 = smov 8  }
 0x266   :  { %346 = dma.vmem_to_hbm [thread:$0]  %s341_s5, 256, %s582_s8, [#allocation3], %s451_s25, %s451_s25, %s452_s0  }
 0x267   :  { %447 = dma.done.wait [#allocation3], 256  }
 0x268   :  { %448 = vsyncadd [#allocation3], 4294967040 }
 0x269   :  { %350 = vsyncpa [#allocation3], 1 }

</bundles_post_ra>
